<compile_context>
chip_gen: v5e
topology: v5e:2x2
jax: 0.10.0
libtpu: 0.0.40
codegen_flags: <defaults>
</compile_context>

<pallas_src>
import jax
import jax.numpy as jnp
import numpy as np
from jax.experimental import pallas as pl
from jax.experimental.pallas import tpu as pltpu

NEG_SLOPE = 0.01  # nn.LeakyReLU() default

# Logical (PyTorch) dims; hidden dims are zero-padded to MXU/lane-aligned sizes.
D_IN, H1, H2, D_OUT = 83, 300, 100, 4
PH1, PH2 = 384, 128


def _round_up(n, m):
    return ((n + m - 1) // m) * m


def _pick_tb(B):
    # >= 2 grid steps when the batch allows it (v7x megacore sharding of the
    # "parallel" axis), capped at 1024 to amortize per-step overhead while
    # fitting comfortably inside the v5e 16 MiB scoped-VMEM default.
    half = _round_up(max(pl.cdiv(B, 2), 1), 8)
    return max(8, min(1024, half))


def mlp_kernel(x_ref, w1_ref, b1_ref, w2_ref, b2_ref, w3_ref, b3_ref, o_ref):
    # x_ref: (tb, 83) f32; weights bf16; biases (1, N) f32; o_ref: (tb, 4) f32.
    # Fused 3-layer MLP on one batch tile; MXU runs bf16 x bf16 -> f32 accumulate.
    x = x_ref[...].astype(jnp.bfloat16)                       # in-kernel cast, no host pre-pass
    h = jnp.dot(x, w1_ref[...], preferred_element_type=jnp.float32) + b1_ref[...]
    h = jnp.maximum(h, NEG_SLOPE * h).astype(jnp.bfloat16)    # LeakyReLU, fused with bf16 cast
    h = jnp.dot(h, w2_ref[...], preferred_element_type=jnp.float32) + b2_ref[...]
    h = jnp.maximum(h, NEG_SLOPE * h).astype(jnp.bfloat16)
    o = jnp.dot(h, w3_ref[...], preferred_element_type=jnp.float32) + b3_ref[...]
    o_ref[...] = o.astype(o_ref.dtype)


def pack_params(params):
    """Zero-pad f32 (in,out) weights / (1,out) biases to aligned hidden dims.

    W1: (83,300)->(83,384) bf16, W2: (300,100)->(384,128) bf16, W3: (100,4)->(128,4) bf16.
    Biases stay f32.  Zero padding is numerically exact.
    """
    w1, b1, w2, b2, w3, b3 = params

    def pad_w(w, pin, pout):
        return jnp.zeros((pin, pout), jnp.float32).at[:w.shape[0], :w.shape[1]].set(w)

    def pad_b(b, pout):
        return jnp.zeros((1, pout), jnp.float32).at[:, :b.shape[1]].set(b)

    return (
        pad_w(w1, D_IN, PH1).astype(jnp.bfloat16), pad_b(b1, PH1),
        pad_w(w2, PH1, PH2).astype(jnp.bfloat16), pad_b(b2, PH2),
        pad_w(w3, PH2, D_OUT).astype(jnp.bfloat16), pad_b(b3, D_OUT),
    )


def net_forward(x, packed_params, *, tb=None):
    """x: (B, 83) float32 -> (B, 4) float32.  packed_params from pack_params()."""
    w1, b1, w2, b2, w3, b3 = packed_params
    B = x.shape[0]
    if tb is None:
        tb = _pick_tb(B)

    grid = (pl.cdiv(B, tb),)
    out = pl.pallas_call(
        mlp_kernel,
        out_shape=jax.ShapeDtypeStruct((B, D_OUT), jnp.float32),
        grid_spec=pltpu.PrefetchScalarGridSpec(
            num_scalar_prefetch=0,
            grid=grid,
            in_specs=[
                pl.BlockSpec((tb, D_IN), lambda i: (i, 0)),     # x tile, unpadded 83 lanes
                pl.BlockSpec((D_IN, PH1), lambda i: (0, 0)),    # W1 (VMEM-resident)
                pl.BlockSpec((1, PH1), lambda i: (0, 0)),       # b1 (resident)
                pl.BlockSpec((PH1, PH2), lambda i: (0, 0)),     # W2 (resident)
                pl.BlockSpec((1, PH2), lambda i: (0, 0)),       # b2 (resident)
                pl.BlockSpec((PH2, D_OUT), lambda i: (0, 0)),   # W3 (resident)
                pl.BlockSpec((1, D_OUT), lambda i: (0, 0)),     # b3 (resident)
            ],
            out_specs=pl.BlockSpec((tb, D_OUT), lambda i: (i, 0)),  # narrow (tb, 4) writeback
        ),
        compiler_params=pltpu.CompilerParams(
            dimension_semantics=("parallel",),
        ),
    )(x, w1, b1, w2, b2, w3, b3)
    return out


def init_params(key):
    """Deterministic init mimicking nn.Linear default U(-1/sqrt(fan_in), 1/sqrt(fan_in)).
    Weights stored as (in, out) so the forward is y = x @ W + b."""
    dims = [(D_IN, H1), (H1, H2), (H2, D_OUT)]
    params = []
    keys = jax.random.split(key, 2 * len(dims))
    for i, (fan_in, fan_out) in enumerate(dims):
        bound = 1.0 / np.sqrt(fan_in)
        w = jax.random.uniform(keys[2 * i], (fan_in, fan_out),
                               minval=-bound, maxval=bound, dtype=jnp.float32)
        b = jax.random.uniform(keys[2 * i + 1], (1, fan_out),
                               minval=-bound, maxval=bound, dtype=jnp.float32)
        params += [w, b]
    return tuple(params)


def net_forward_ref(x, params):
    """Pure-JAX f32 reference (unpadded params)."""
    w1, b1, w2, b2, w3, b3 = params
    h = jnp.maximum(x @ w1 + b1, NEG_SLOPE * (x @ w1 + b1))
    h = jnp.maximum(h @ w2 + b2, NEG_SLOPE * (h @ w2 + b2))
    return h @ w3 + b3


if __name__ == "__main__":
    key = jax.random.PRNGKey(0)
    pkey, xkey = jax.random.split(key)
    params = init_params(pkey)
    packed = pack_params(params)

    B = 8
    x = jax.random.normal(xkey, (B, D_IN), dtype=jnp.float32)

    out = net_forward(x, packed)
    out = jax.block_until_ready(out)

    ref = net_forward_ref(x, params)
    # bf16 weights/activations with f32 accumulation -> loose tolerance vs. f32 reference.
    np.testing.assert_allclose(np.asarray(out), np.asarray(ref), rtol=3e-2, atol=3e-2)

    print("KERNEL_OK")
</pallas_src>

<mosaic_0001>
module attributes {stable_mosaic.version = 11 : i64} {
  func.func @mlp_kernel(%arg0: i32, %arg1: memref<8x83xf32, #tpu.memory_space<vmem>>, %arg2: memref<83x384xbf16, #tpu.memory_space<vmem>>, %arg3: memref<1x384xf32, #tpu.memory_space<vmem>>, %arg4: memref<384x128xbf16, #tpu.memory_space<vmem>>, %arg5: memref<1x128xf32, #tpu.memory_space<vmem>>, %arg6: memref<128x4xbf16, #tpu.memory_space<vmem>>, %arg7: memref<1x4xf32, #tpu.memory_space<vmem>>, %arg8: memref<8x4xf32, #tpu.memory_space<vmem>>) attributes {dimension_semantics = [#tpu.dimension_semantics<parallel>], iteration_bounds = array<i64: 1>, scalar_prefetch = 0 : i64, scratch_operands = 0 : i64, tpu.core_type = #tpu.core_type<tc>, window_params = [{transform_indices = @transform_0, window_bounds = array<i64: 8, 83>}, {pipeline_mode = #tpu.pipeline_mode<synchronous>, transform_indices = @transform_1, window_bounds = array<i64: 83, 384>}, {pipeline_mode = #tpu.pipeline_mode<synchronous>, transform_indices = @transform_2, window_bounds = array<i64: 1, 384>}, {pipeline_mode = #tpu.pipeline_mode<synchronous>, transform_indices = @transform_3, window_bounds = array<i64: 384, 128>}, {pipeline_mode = #tpu.pipeline_mode<synchronous>, transform_indices = @transform_4, window_bounds = array<i64: 1, 128>}, {pipeline_mode = #tpu.pipeline_mode<synchronous>, transform_indices = @transform_5, window_bounds = array<i64: 128, 4>}, {pipeline_mode = #tpu.pipeline_mode<synchronous>, transform_indices = @transform_6, window_bounds = array<i64: 1, 4>}, {transform_indices = @transform_7, window_bounds = array<i64: 8, 4>}]} {
    %c0 = arith.constant 0 : index
    %c0_0 = arith.constant 0 : index
    %0 = vector.load %arg1[%c0, %c0_0] : memref<8x83xf32, #tpu.memory_space<vmem>>, vector<8x83xf32>
    %1 = arith.truncf %0 : vector<8x83xf32> to vector<8x83xbf16>
    %c0_1 = arith.constant 0 : index
    %c0_2 = arith.constant 0 : index
    %2 = vector.load %arg2[%c0_1, %c0_2] : memref<83x384xbf16, #tpu.memory_space<vmem>>, vector<83x384xbf16>
    %cst = arith.constant dense<0.000000e+00> : vector<8x384xf32>
    %3 = tpu.matmul %1, %2, %cst {dimension_numbers = #tpu.dot_dimension_numbers<[1], [0], [0], [1], [0, 0, 1, 1], [], []>} : vector<8x83xbf16>, vector<83x384xbf16>, vector<8x384xf32> -> vector<8x384xf32>
    %c0_3 = arith.constant 0 : index
    %c0_4 = arith.constant 0 : index
    %4 = vector.load %arg3[%c0_3, %c0_4] : memref<1x384xf32, #tpu.memory_space<vmem>>, vector<1x384xf32>
    %5 = vector.broadcast %4 : vector<1x384xf32> to vector<8x384xf32>
    %6 = arith.addf %3, %5 : vector<8x384xf32>
    %cst_5 = arith.constant 0.00999999977 : f32
    %7 = vector.broadcast %cst_5 : f32 to vector<8x384xf32>
    %8 = arith.mulf %7, %6 : vector<8x384xf32>
    %9 = arith.maximumf %6, %8 : vector<8x384xf32>
    %10 = arith.truncf %9 : vector<8x384xf32> to vector<8x384xbf16>
    %c0_6 = arith.constant 0 : index
    %c0_7 = arith.constant 0 : index
    %11 = vector.load %arg4[%c0_6, %c0_7] : memref<384x128xbf16, #tpu.memory_space<vmem>>, vector<384x128xbf16>
    %cst_8 = arith.constant dense<0.000000e+00> : vector<8x128xf32>
    %12 = tpu.matmul %10, %11, %cst_8 {dimension_numbers = #tpu.dot_dimension_numbers<[1], [0], [0], [1], [0, 0, 1, 1], [], []>} : vector<8x384xbf16>, vector<384x128xbf16>, vector<8x128xf32> -> vector<8x128xf32>
    %c0_9 = arith.constant 0 : index
    %c0_10 = arith.constant 0 : index
    %13 = vector.load %arg5[%c0_9, %c0_10] : memref<1x128xf32, #tpu.memory_space<vmem>>, vector<1x128xf32>
    %14 = vector.broadcast %13 : vector<1x128xf32> to vector<8x128xf32>
    %15 = arith.addf %12, %14 : vector<8x128xf32>
    %cst_11 = arith.constant 0.00999999977 : f32
    %16 = vector.broadcast %cst_11 : f32 to vector<8x128xf32>
    %17 = arith.mulf %16, %15 : vector<8x128xf32>
    %18 = arith.maximumf %15, %17 : vector<8x128xf32>
    %19 = arith.truncf %18 : vector<8x128xf32> to vector<8x128xbf16>
    %c0_12 = arith.constant 0 : index
    %c0_13 = arith.constant 0 : index
    %20 = vector.load %arg6[%c0_12, %c0_13] : memref<128x4xbf16, #tpu.memory_space<vmem>>, vector<128x4xbf16>
    %cst_14 = arith.constant dense<0.000000e+00> : vector<8x4xf32>
    %21 = tpu.matmul %19, %20, %cst_14 {dimension_numbers = #tpu.dot_dimension_numbers<[1], [0], [0], [1], [0, 0, 1, 1], [], []>} : vector<8x128xbf16>, vector<128x4xbf16>, vector<8x4xf32> -> vector<8x4xf32>
    %c0_15 = arith.constant 0 : index
    %c0_16 = arith.constant 0 : index
    %22 = vector.load %arg7[%c0_15, %c0_16] : memref<1x4xf32, #tpu.memory_space<vmem>>, vector<1x4xf32>
    %23 = vector.broadcast %22 : vector<1x4xf32> to vector<8x4xf32>
    %24 = arith.addf %21, %23 : vector<8x4xf32>
    %c0_17 = arith.constant 0 : index
    %c0_18 = arith.constant 0 : index
    %25 = vector.load %arg8[%c0_17, %c0_18] : memref<8x4xf32, #tpu.memory_space<vmem>>, vector<8x4xf32>
    tpu.vector_store %arg8[%c0_17, %c0_18], %24 {strides = array<i32>} : memref<8x4xf32, #tpu.memory_space<vmem>>, vector<8x4xf32>,
    return
  }
  func.func @transform_0(%arg0: i32) -> (i32, i32) {
    %c0_i32 = arith.constant 0 : i32
    %c0_i32_0 = arith.constant 0 : i32
    return %arg0, %c0_i32 : i32, i32
  }
  func.func @transform_1(%arg0: i32) -> (i32, i32) {
    %c0_i32 = arith.constant 0 : i32
    %c0_i32_0 = arith.constant 0 : i32
    %c0_i32_1 = arith.constant 0 : i32
    return %c0_i32, %c0_i32_0 : i32, i32
  }
  func.func @transform_2(%arg0: i32) -> (i32, i32) {
    %c0_i32 = arith.constant 0 : i32
    %c0_i32_0 = arith.constant 0 : i32
    %c0_i32_1 = arith.constant 0 : i32
    return %c0_i32, %c0_i32_0 : i32, i32
  }
  func.func @transform_3(%arg0: i32) -> (i32, i32) {
    %c0_i32 = arith.constant 0 : i32
    %c0_i32_0 = arith.constant 0 : i32
    %c0_i32_1 = arith.constant 0 : i32
    return %c0_i32, %c0_i32_0 : i32, i32
  }
  func.func @transform_4(%arg0: i32) -> (i32, i32) {
    %c0_i32 = arith.constant 0 : i32
    %c0_i32_0 = arith.constant 0 : i32
    %c0_i32_1 = arith.constant 0 : i32
    return %c0_i32, %c0_i32_0 : i32, i32
  }
  func.func @transform_5(%arg0: i32) -> (i32, i32) {
    %c0_i32 = arith.constant 0 : i32
    %c0_i32_0 = arith.constant 0 : i32
    %c0_i32_1 = arith.constant 0 : i32
    return %c0_i32, %c0_i32_0 : i32, i32
  }
  func.func @transform_6(%arg0: i32) -> (i32, i32) {
    %c0_i32 = arith.constant 0 : i32
    %c0_i32_0 = arith.constant 0 : i32
    %c0_i32_1 = arith.constant 0 : i32
    return %c0_i32, %c0_i32_0 : i32, i32
  }
  func.func @transform_7(%arg0: i32) -> (i32, i32) {
    %c0_i32 = arith.constant 0 : i32
    %c0_i32_0 = arith.constant 0 : i32
    return %arg0, %c0_i32 : i32, i32
  }
}

</mosaic_0001>

<bundles_post_ra>
// kernel: tpu_custom_call.1
= control target key start
LH: loop header
LB: loop body
LE: loop exit
PB: predicated region body
PF: predicated region fallthrough
CT: control target
= control target key end

     0   :  { %12 = vsyncpa [#allocation3], 0  ;;  %s962_s0 = inlined_call_operand.vmem [shape: f32[8,83], index: 0, kind: input, shape index: {}]   ;;  %s963_s1 = inlined_call_operand.hbm [shape: bf16[83,384], index: 1, kind: input, shape index: {}]   ;;  %s964_s2 = inlined_call_operand.vmem [shape: f32[1,384], index: 2, kind: input, shape index: {}]   ;;  %s965_s3 = inlined_call_operand.hbm [shape: bf16[384,128], index: 3, kind: input, shape index: {}]   ;;  %s966_s4 = inlined_call_operand.vmem [shape: f32[1,128], index: 4, kind: input, shape index: {}]   ;;  %s967_s5 = inlined_call_operand.vmem [shape: bf16[128,4], index: 5, kind: input, shape index: {}]   ;;  %s968_s6 = inlined_call_operand.vmem [shape: f32[1,4], index: 6, kind: input, shape index: {}]   ;;  %s969_s7 = inlined_call_operand.vmem [shape: f32[8,4], index: 7, kind: output, shape index: {}]  }
   0x1   :  { %s20_s26 = sshll.u32 %s963_s1, 4  ;;  %s21_s26 = int_to_ptr.hbm [resolvable:$true] %s20_s26 }
   0x2   :  { %13 = vsyncpa [#allocation5], 0  ;;  %s870_s27 = smov [#allocation2]   ;;  %s35_s8 = sshll.u32 %s965_s3, 4  ;;  %s36_s8 = int_to_ptr.hbm [resolvable:$true] %s35_s8 }
   0x3   :  { %s22_s28 = sshll.u32 %s870_s27, 4  ;;  %s871_s9 = smov 192   ;;  %s23_s28 = int_to_ptr.vmem [resolvable:$true] %s22_s28 }
   0x4   :  { %s872_s10 = smov 12   ;;  %s873_s11 = smov [#allocation4]  }
   0x5   :  { %28 = dma.hbm_to_vmem [thread:$0]  %s21_s26, 2112, %s23_s28, [#allocation3], %s871_s9, %s871_s9, %s872_s10  }
   0x6   :  { %s37_s12 = sshll.u32 %s873_s11, 4  ;;  %s874_s13 = smov 64   ;;  %s38_s12 = int_to_ptr.vmem [resolvable:$true] %s37_s12 }
   0x7   :  { %s875_s14 = smov 4  }
   0x8   :  { %43 = dma.hbm_to_vmem [thread:$0]  %s36_s8, 3072, %s38_s12, [#allocation5], %s874_s13, %s874_s13, %s875_s14  }
   0x9   :  { %866 = dma.done.wait [#allocation3], 2112  }
   0xa   :  { %867 = vsyncadd [#allocation3], 4294965184 }
   0xb   :  { %868 = dma.done.wait [#allocation5], 3072  }
   0xc   :  { %869 = vsyncadd [#allocation5], 4294964224  ;;  %vm183_vm0 = vcmask 1040384   ;;  %vm184_vm1 = vcmask 1041408   ;;  %v876_v0 = vmov 65535   ;;  %v784_v32 = vld [vmem:[#allocation4 + $0x38] sm:$0xff] }
   0xd   :  { %v185_v1 = vsel %vm183_vm0, 4294967295, %v876_v0  ;;  %v81_v2 = vld [vmem:[#allocation2 + $0x78] sm:$0x33]  ;;  %v82_v3 = vld [vmem:[#allocation2 + $0x80] sm:$0x3]  ;;  %440 = vmatpush.bf16.msra.mxu3 %v784_v32  ;;  %v782_v49 = vld [vmem:[#allocation4 + $0x28] sm:$0xff] }
   0xe   :  { %v143_v4 = vunpack.c.l.b16 %v81_v2  ;;  %v144_v5 = vunpack.c.h.b16 %v81_v2  ;;  %v145_v6 = vunpack.c.l.b16 %v82_v3  ;;  %v186_v7 = vsel %vm184_vm1, %v185_v1, 0  ;;  %v621_v11 = vld [vmem:[#allocation2 + $0x60] sm:$0xf]  ;;  %v775_v12 = vld [vmem:[#allocation2 + $0x68] sm:$0xf0]  ;;  %v783_v39 = vld [vmem:[#allocation4 + $0x30] sm:$0xff] }
   0xf   :  { %v774_v13 = vld [vmem:[#allocation2 + $0x64] sm:$0xf]  ;;  %v623_v14 = vld [vmem:[#allocation2 + $0x6c] sm:$0xf0]  ;;  %v629_v18 = vld [vmem:[#allocation2 + $0x68] sm:$0xf]  ;;  %v622_v20 = vor.u32 %v775_v12, %v621_v11 }
  0x10   :  { %v161_v8 = vpack.c.b16 %v143_v4, %v143_v4  ;;  %v162_v9 = vpack.c.b16 %v144_v5, %v144_v5  ;;  %v163_v10 = vpack.c.b16 %v145_v6, %v145_v6  ;;  %v776_v19 = vld [vmem:[#allocation2 + $0x70] sm:$0xf0]  ;;  %v626_v21 = vor.u32 %v774_v13, %v623_v14  ;;  %v609_v22 = vld [vmem:[#allocation2 + $0x48] sm:$0xf]  ;;  %v771_v25 = vld [vmem:[#allocation2 + $0x4c] sm:$0xf] }
  0x11   :  { %v630_v23 = vor.u32 %v776_v19, %v629_v18  ;;  %v772_v24 = vld [vmem:[#allocation2 + $0x50] sm:$0xf0]  ;;  %v611_v26 = vld [vmem:[#allocation2 + $0x54] sm:$0xf0]  ;;  %v617_v27 = vld [vmem:[#allocation2 + $0x50] sm:$0xf]  ;;  %441 = vmatpush.bf16.msra.mxu3 %v783_v39 }
  0x12   :  { %v188_v15 = vand.u32 %v186_v7, %v161_v8  ;;  %v191_v16 = vand.u32 %v186_v7, %v162_v9  ;;  %v194_v17 = vand.u32 %v186_v7, %v163_v10  ;;  %v773_v28 = vld [vmem:[#allocation2 + $0x58] sm:$0xf0]  ;;  %v610_v29 = vor.u32 %v772_v24, %v609_v22  ;;  %v597_v31 = vld [vmem:[#allocation2 + $0x30] sm:$0xf]  ;;  %v768_v35 = vld [vmem:[#allocation2 + $0x34] sm:$0xf] }
  0x13   :  { %v614_v30 = vor.u32 %v771_v25, %v611_v26  ;;  %v618_v33 = vor.u32 %v773_v28, %v617_v27  ;;  %v769_v34 = vld [vmem:[#allocation2 + $0x38] sm:$0xf0]  ;;  %v599_v36 = vld [vmem:[#allocation2 + $0x3c] sm:$0xf0]  ;;  %v605_v37 = vld [vmem:[#allocation2 + $0x38] sm:$0xf] }
  0x14   :  { %198 = vmatpush.bf16.msra.mxu0 %v188_v15  ;;  %211 = vmatpush.bf16.msra.mxu1 %v191_v16  ;;  %v770_v38 = vld [vmem:[#allocation2 + $0x40] sm:$0xf0]  ;;  %v598_v40 = vor.u32 %v769_v34, %v597_v31  ;;  %v602_v41 = vor.u32 %v768_v35, %v599_v36  ;;  %v585_v42 = vld [vmem:[#allocation2 + $0x18] sm:$0xf]  ;;  %v765_v44 = vld [vmem:[#allocation2 + $0x1c] sm:$0xf] }
  0x15   :  { %224 = vmatpush.bf16.msra.mxu2 %v194_v17  ;;  %v766_v43 = vld [vmem:[#allocation2 + $0x20] sm:$0xf0]  ;;  %v606_v45 = vor.u32 %v770_v38, %v605_v37  ;;  %v587_v46 = vld [vmem:[#allocation2 + $0x24] sm:$0xf0]  ;;  %v593_v47 = vld [vmem:[#allocation2 + $0x20] sm:$0xf]  ;;  %442 = vmatpush.bf16.msra.mxu3 %v782_v49 }
  0x16   :  { %v767_v48 = vld [vmem:[#allocation2 + $0x28] sm:$0xf0]  ;;  %v586_v50 = vor.u32 %v766_v43, %v585_v42  ;;  %v590_v51 = vor.u32 %v765_v44, %v587_v46  ;;  %v573_v52 = vld [vmem:[#allocation2] sm:$0xf]  ;;  %v762_v55 = vld [vmem:[#allocation2 + $0x4] sm:$0xf] }
  0x17   :  { %v594_v53 = vor.u32 %v767_v48, %v593_v47  ;;  %v763_v54 = vld [vmem:[#allocation2 + $0x8] sm:$0xf0]  ;;  %v575_v56 = vld [vmem:[#allocation2 + $0xc] sm:$0xf0]  ;;  %v581_v57 = vld [vmem:[#allocation2 + $0x8] sm:$0xf] }
  0x18   :  { %199 = vmatpush.bf16.msra.mxu0 %v622_v20  ;;  %212 = vmatpush.bf16.msra.mxu1 %v626_v21  ;;  %v764_v58 = vld [vmem:[#allocation2 + $0x10] sm:$0xf0]  ;;  %v781_v59 = vld [vmem:[#allocation4 + $0x20] sm:$0xff]  ;;  %v574_v60 = vor.u32 %v763_v54, %v573_v52  ;;  %v578_v61 = vor.u32 %v762_v55, %v575_v56  ;;  %v792_v0 = vld [vmem:[#allocation4 + $0x78] sm:$0xff]  ;;  %vm179_vm2 = vcmask 678912   ;;  %vm563_vm3 = vcmask 31744  }
  0x19   :  { %225 = vmatpush.bf16.msra.mxu2 %v630_v23  ;;  %v59_v62 = vld [vmem:[%s962_s0] sm:$0xff]  ;;  %v582_v63 = vor.u32 %v764_v58, %v581_v57  ;;  %443 = vmatpush.bf16.msra.mxu3 %v781_v59  ;;  %v791_v4 = vld [vmem:[#allocation4 + $0x70] sm:$0xff]  ;;  %v790_v7 = vld [vmem:[#allocation4 + $0x68] sm:$0xff] }
  0x1a   :  { %v800_v1 = vld [vmem:[#allocation4 + $0xb8] sm:$0xff]  ;;  %v60_v3 = vpack.c.bf16 %v59_v62, %v59_v62  ;;  %v799_v5 = vld [vmem:[#allocation4 + $0xb0] sm:$0xff]  ;;  %v798_v8 = vld [vmem:[#allocation4 + $0xa8] sm:$0xff] }
  0x1b   :  { %v780_v2 = vld [vmem:[#allocation4 + $0x18] sm:$0xff]  ;;  %v779_v6 = vld [vmem:[#allocation4 + $0x10] sm:$0xff]  ;;  %v789_v9 = vld [vmem:[#allocation4 + $0x60] sm:$0xff] }
  0x1c   :  { %200 = vmatpush.bf16.msra.mxu0 %v610_v29  ;;  %213 = vmatpush.bf16.msra.mxu1 %v614_v30  ;;  %v797_v10 = vld [vmem:[#allocation4 + $0xa0] sm:$0xff]  ;;  %v788_v11 = vld [vmem:[#allocation4 + $0x58] sm:$0xff]  ;;  %v787_v12 = vld [vmem:[#allocation4 + $0x50] sm:$0xff] }
  0x1d   :  { %226 = vmatpush.bf16.msra.mxu2 %v618_v33  ;;  %444 = vmatpush.bf16.msra.mxu3 %v780_v2  ;;  %v796_v13 = vld [vmem:[#allocation4 + $0x98] sm:$0xff]  ;;  %v778_v14 = vld [vmem:[#allocation4 + $0x8] sm:$0xff]  ;;  %v795_v16 = vld [vmem:[#allocation4 + $0x90] sm:$0xff] }
  0x1e   :  { %v786_v15 = vld [vmem:[#allocation4 + $0x48] sm:$0xff]  ;;  %v777_v17 = vld [vmem:[#allocation4] sm:$0xff]  ;;  %v808_v21 = vld [vmem:[%s967_s5 + $0x38] sm:$0xff] }
  0x1f   :  { %v785_v18 = vld [vmem:[#allocation4 + $0x40] sm:$0xff]  ;;  %v794_v19 = vld [vmem:[#allocation4 + $0x88] sm:$0xff]  ;;  %v83_v24 = vld [vmem:[%s964_s2] sm:$0x7] }
  0x20   :  { %201 = vmatpush.bf16.msra.mxu0 %v598_v40  ;;  %214 = vmatpush.bf16.msra.mxu1 %v602_v41  ;;  %v793_v20 = vld [vmem:[#allocation4 + $0x80] sm:$0xff]  ;;  %v807_v22 = vld [vmem:[%s967_s5 + $0x30] sm:$0xff]  ;;  %v85_v25 = vperm.slane %v83_v24, 0  ;;  %v86_v26 = vperm.slane %v83_v24, 1  ;;  %v87_v33 = vperm.slane %v83_v24, 2  ;;  %v804_v47 = vld [vmem:[%s967_s5 + $0x18] sm:$0xff] }
  0x21   :  { %227 = vmatpush.bf16.msra.mxu2 %v606_v45  ;;  %445 = vmatpush.bf16.msra.mxu3 %v779_v6  ;;  %v806_v23 = vld [vmem:[%s967_s5 + $0x28] sm:$0xff]  ;;  %v805_v46 = vld [vmem:[%s967_s5 + $0x20] sm:$0xff]  ;;  %v803_v48 = vld [vmem:[%s967_s5 + $0x10] sm:$0xff] }
  0x22   :  { %v802_v49 = vld [vmem:[%s967_s5 + $0x8] sm:$0xff]  ;;  %v816_v52 = vld [vmem:[%s966_s4] ss:$0 sm:$0xff] }
  0x24   :  { %202 = vmatpush.bf16.msra.mxu0 %v586_v50  ;;  %215 = vmatpush.bf16.msra.mxu1 %v590_v51  ;;  %v801_v50 = vld [vmem:[%s967_s5] sm:$0xff] }
  0x25   :  { %228 = vmatpush.bf16.msra.mxu2 %v594_v53  ;;  %446 = vmatpush.bf16.msra.mxu3 %v778_v14 }
  0x28   :  { %203 = vmatpush.bf16.msra.mxu0 %v574_v60  ;;  %216 = vmatpush.bf16.msra.mxu1 %v578_v61 }
  0x29   :  { %229 = vmatpush.bf16.msra.mxu2 %v582_v63  ;;  %447 = vmatpush.bf16.msra.mxu3 %v777_v17 }
  0x2b   :  { %631 = vmatmul.msk.bf16.vlgmr.msra.gmra.mxu0 %vm179_vm2, %v60_v3  ;;  %632 = vmatmul.msk.bf16.vlgmr.msra.gmra.mxu1 %vm179_vm2, %v60_v3 }
  0x2c   :  { %453 = vmatpush.bf16.msrb.mxu0 %v792_v0  ;;  %466 = vmatpush.bf16.msrb.mxu1 %v800_v1  ;;  %v817_v0 = vld [vmem:[%s968_s6] ss:$0 sm:$0xff] }
  0x2d   :  { %633 = vmatmul.msk.bf16.vlgmr.msra.gmra.mxu2 %vm179_vm2, %v60_v3 }
  0x2e   :  { %550 = vmatpush.bf16.msrb.mxu2 %v808_v21 }
  0x30   :  { %454 = vmatpush.bf16.msrb.mxu0 %v791_v4  ;;  %467 = vmatpush.bf16.msrb.mxu1 %v799_v5 }
  0x32   :  { %551 = vmatpush.bf16.msrb.mxu2 %v807_v22 }
  0x34   :  { %455 = vmatpush.bf16.msrb.mxu0 %v790_v7  ;;  %468 = vmatpush.bf16.msrb.mxu1 %v798_v8 }
  0x36   :  { %552 = vmatpush.bf16.msrb.mxu2 %v806_v23 }
  0x38   :  { %456 = vmatpush.bf16.msrb.mxu0 %v789_v9  ;;  %469 = vmatpush.bf16.msrb.mxu1 %v797_v10 }
  0x3a   :  { %553 = vmatpush.bf16.msrb.mxu2 %v805_v46 }
  0x3c   :  { %457 = vmatpush.bf16.msrb.mxu0 %v788_v11  ;;  %470 = vmatpush.bf16.msrb.mxu1 %v796_v13 }
  0x3e   :  { %554 = vmatpush.bf16.msrb.mxu2 %v804_v47 }
  0x40   :  { %458 = vmatpush.bf16.msrb.mxu0 %v787_v12  ;;  %471 = vmatpush.bf16.msrb.mxu1 %v795_v16 }
  0x42   :  { %555 = vmatpush.bf16.msrb.mxu2 %v803_v48 }
  0x44   :  { %459 = vmatpush.bf16.msrb.mxu0 %v786_v15  ;;  %472 = vmatpush.bf16.msrb.mxu1 %v794_v19 }
  0x46   :  { %556 = vmatpush.bf16.msrb.mxu2 %v802_v49 }
  0x48   :  { %460 = vmatpush.bf16.msrb.mxu0 %v785_v18  ;;  %473 = vmatpush.bf16.msrb.mxu1 %v793_v20 }
  0x4a   :  { %557 = vmatpush.bf16.msrb.mxu2 %v801_v50 }
  0xa8   :  { %v205_v27 = vpop.f32.mrf.mxu0  ;;  %v218_v28 = vpop.f32.mrf.mxu1 }
  0xa9   :  { %v206_v29 = vadd.f32 %v205_v27, %v85_v25  ;;  %v219_v30 = vadd.f32 %v218_v28, %v86_v26 }
  0xab   :  { %v235_v31 = vmul.f32 0.01, %v206_v29  ;;  %v236_v32 = vmul.f32 0.01, %v219_v30 }
  0xad   :  { %v239_v34 = vmax.f32 %v219_v30, %v236_v32  ;;  %v238_v35 = vmax.f32 %v206_v29, %v235_v31 }
  0xaf   :  { %v242_v36 = vpack.c.bf16 %v239_v34, %v239_v34  ;;  %v241_v38 = vpack.c.bf16 %v238_v35, %v238_v35 }
  0xb0   :  { %v231_v37 = vpop.f32.mrf.mxu2  ;;  %v207_v40 = vpop.f32.mrf.mxu0 }
  0xb1   :  { %v232_v39 = vadd.f32 %v231_v37, %v87_v33  ;;  %v220_v41 = vpop.f32.mrf.mxu1  ;;  %448 = vmatmul.bf16.vlgmr.msra.gmra.mxu3 %v241_v38  ;;  %461 = vmatmul.bf16.vlgmr.msrb.gmra.mxu0 %v242_v36 }
  0xb3   :  { %v237_v42 = vmul.f32 0.01, %v232_v39 }
  0xb5   :  { %v240_v43 = vmax.f32 %v232_v39, %v237_v42 }
  0xb7   :  { %v243_v44 = vpack.c.bf16 %v240_v43, %v240_v43 }
  0xb8   :  { %v233_v45 = vpop.f32.mrf.mxu2 }
  0xb9   :  { %474 = vmatmul.bf16.vlgmr.msrb.gmra.mxu1 %v243_v44 }
 0x12e   :  { %v462_v51 = vpop.f32.mrf.mxu0 }
 0x134   :  { %v449_v53 = vpop.f32.mrf.mxu3 }
 0x135   :  { %v450_v54 = vadd.f32 %v816_v52, %v449_v53 }
 0x136   :  { %v475_v55 = vpop.f32.mrf.mxu1  ;;  %v464_v56 = vpop.f32.mrf.mxu0 }
 0x137   :  { %v463_v57 = vadd.f32 %v462_v51, %v450_v54 }
 0x139   :  { %v476_v58 = vadd.f32 %v475_v55, %v463_v57 }
 0x13b   :  { %v479_v59 = vmul.f32 0.01, %v476_v58 }
 0x13c   :  { %v451_v60 = vpop.f32.mrf.mxu3 }
 0x13d   :  { %v480_v61 = vmax.f32 %v476_v58, %v479_v59 }
 0x13e   :  { %v477_v62 = vpop.f32.mrf.mxu1 }
 0x13f   :  { %v481_v63 = vpack.c.bf16 %v480_v61, %v480_v61 }
 0x141   :  { %558 = vmatmul.bf16.vlgmr.msrb.gmra.mxu2 %v481_v63 }
 0x1c4   :  { %v559_v1 = vpop.f32.mrf.mxu2 }
 0x1c5   :  { %v560_v2 = vadd.f32 %v817_v0, %v559_v1 }
 0x1c7   :  { %564 = vst.msk [vmem:[%s969_s7] sm:$0xff] %vm563_vm3, %v560_v2 }
 0x1cc   :  { %v561_v3 = vpop.f32.mrf.mxu2 }
 0x1cd   :  { %569 = vsyncpa [#allocation3], 1 }
 0x1ce   :  { %570 = vsyncpa [#allocation5], 1 }

</bundles_post_ra>
